<compile_context>
chip_gen: v7x
topology: tpu7x:2x2x1
jax: 0.10.0
libtpu: 0.0.40
codegen_flags: <defaults>
</compile_context>

<pallas_src>
import jax
import jax.numpy as jnp
from jax.experimental import pallas as pl
from jax.experimental.pallas import tpu as pltpu

_LANE = 128
_NEG_BIG = -1.0e30  # folded into the bias of padded class columns


def _round_up(x, m):
    return ((x + m - 1) // m) * m


def _uadhoc_kernel(x_ref, w_ref, b_ref, o_ref):
    # x_ref: (TB, D), w_ref: (D, Kp) in compute dtype; b_ref: (1, Kp) f32
    # (bias already carries the -1e30 mask on padded class columns).
    logits = jnp.dot(x_ref[...], w_ref[...],
                     preferred_element_type=jnp.float32) + b_ref[...]

    # Numerically stable softmax pieces; y is never materialized.
    m = jnp.max(logits, axis=-1, keepdims=True)
    e = jnp.exp(logits - m)                              # (TB, Kp)
    denom = jnp.sum(e, axis=-1, keepdims=True)           # (TB, 1)

    # EUP approx reciprocal + one Newton-Raphson step on the (TB,1) scalar
    # column: full f32 accuracy, avoids the VALU divide sequence.
    r = pl.reciprocal(denom, approx=True)
    r = r * (2.0 - denom * r)

    # a = (sum(y)/10)^2   with sum(y)   = denom * r
    s = (denom * r) * 0.1
    a = s * s
    # q = sum(y*y)/100    with sum(y*y) = sum(e*e) * r^2
    q = jnp.sum(e * e, axis=-1, keepdims=True) * (r * r) * 0.01

    o_ref[...] = a - q


def prepare_uadhoc_params(w, b, compute_dtype=jnp.float32):
    """Build padded parameters once (hoisted out of the per-call path).

    Pads the class axis to a 128-lane multiple and folds the softmax mask for
    the padded columns into the bias (-1e30 -> exp underflows to exactly 0).
    The bias stays f32 even when the matmul inputs are bf16.
    """
    D, K = w.shape
    Kp = max(_LANE, _round_up(K, _LANE))
    w_p = jnp.zeros((D, Kp), compute_dtype).at[:, :K].set(w.astype(compute_dtype))
    b_p = jnp.full((1, Kp), _NEG_BIG, jnp.float32).at[:, :K].set(
        b.reshape(1, K).astype(jnp.float32))
    return w_p, b_p


def _choose_batch_tile(B, tile_b):
    """Pick (tb, Bp): sublane-aligned tile, >=2 grid steps when there is
    enough work (v7x megacore), and prefer a tile that divides Bp exactly so
    no large jnp.pad copy of x is needed."""
    Bp = _round_up(B, 8)                       # sublane alignment (unavoidable)
    cap = max(8, _round_up(min(tile_b, Bp), 8))
    if Bp > 8 and cap >= Bp:                   # don't collapse grid to 1 step
        cap = _round_up(pl.cdiv(Bp, 2), 8)
    floor = max(8, (cap // 4) // 8 * 8)        # don't shrink below cap/4
    tb = None
    t = cap
    while t >= floor:
        if Bp % t == 0:
            tb = t
            break
        t -= 8
    if tb is None:                             # awkward B: pad the tail
        tb = cap
        Bp = _round_up(Bp, cap)
    return tb, Bp


def uadhoc_forward(x_nchw, w_p, b_p, *, tile_b=1024,
                   compute_dtype=jnp.float32):
    """x_nchw: (B, C, H, W); w_p: (D, Kp); b_p: (1, Kp). Returns (B, 1) f32."""
    B = x_nchw.shape[0]
    D, Kp = w_p.shape
    x_flat = x_nchw.reshape(B, -1).astype(compute_dtype)
    assert x_flat.shape[1] == D, (x_flat.shape, w_p.shape)

    tb, Bp = _choose_batch_tile(B, tile_b)
    if Bp != B:
        x_flat = jnp.pad(x_flat, ((0, Bp - B), (0, 0)))
    grid_b = Bp // tb

    out = pl.pallas_call(
        _uadhoc_kernel,
        out_shape=jax.ShapeDtypeStruct((Bp, 1), jnp.float32),
        grid=(grid_b,),
        in_specs=[
            # x tile: the only stream that scales with tile_b; pipelined.
            pl.BlockSpec((tb, D), lambda i: (i, 0)),
            # W / b: constant index_map -> fetched once; single buffer.
            pl.BlockSpec((D, Kp), lambda i: (0, 0),
                         pipeline_mode=pl.Buffered(1)),
            pl.BlockSpec((1, Kp), lambda i: (0, 0),
                         pipeline_mode=pl.Buffered(1)),
        ],
        out_specs=pl.BlockSpec((tb, 1), lambda i: (i, 0)),
        compiler_params=pltpu.CompilerParams(
            dimension_semantics=("parallel",),       # megacore-shard batch
            vmem_limit_bytes=48 * 1024 * 1024,       # headroom on v7x 64 MiB
        ),
    )(x_flat, w_p, b_p)

    return out[:B]


def _reference(x_nchw, w, b):
    B = x_nchw.shape[0]
    logits = x_nchw.reshape(B, -1).astype(jnp.float32) @ w + b
    y = jax.nn.softmax(logits, axis=1)
    a = jnp.sum(y, axis=1, keepdims=True) / 10.0
    a = a * a
    q = jnp.sum(y * y, axis=1, keepdims=True) / 100.0
    return a - q


if __name__ == "__main__":
    # Small deterministic shapes: batch=2, channels=4, spatial=16x16, classes=10
    B, C, H, W = 2, 4, 16, 16
    K = 10
    D = C * H * W

    key = jax.random.PRNGKey(0)
    kx, kw, kb = jax.random.split(key, 3)
    x = jax.random.normal(kx, (B, C, H, W), dtype=jnp.float32)
    w = jax.random.normal(kw, (D, K), dtype=jnp.float32) * 0.05
    b = jax.random.normal(kb, (K,), dtype=jnp.float32) * 0.1

    ref = _reference(x, w, b)

    # f32 path (default; matches reference to 1e-5).
    w_p, b_p = prepare_uadhoc_params(w, b)          # built once, reused
    out = uadhoc_forward(x, w_p, b_p)
    jax.block_until_ready(out)
    assert out.shape == (B, 1), out.shape
    assert jnp.allclose(out, ref, atol=1e-5, rtol=1e-5), (out, ref)

    # bf16-input path (halves the x HBM stream; f32 MXU accumulation).
    w_bf, b_bf = prepare_uadhoc_params(w, b, compute_dtype=jnp.bfloat16)
    out_bf = uadhoc_forward(x, w_bf, b_bf, compute_dtype=jnp.bfloat16)
    jax.block_until_ready(out_bf)
    assert out_bf.shape == (B, 1), out_bf.shape
    assert jnp.allclose(out_bf, ref, atol=5e-3, rtol=5e-2), (out_bf, ref)

    print("KERNEL_OK")
</pallas_src>

<mosaic_0001>
module attributes {stable_mosaic.version = 11 : i64} {
  func.func @_uadhoc_kernel(%arg0: i32, %arg1: memref<8x1024xf32, #tpu.memory_space<vmem>>, %arg2: memref<1024x128xf32, #tpu.memory_space<vmem>>, %arg3: memref<1x128xf32, #tpu.memory_space<vmem>>, %arg4: memref<8x1xf32, #tpu.memory_space<vmem>>) attributes {dimension_semantics = [#tpu.dimension_semantics<parallel>], iteration_bounds = array<i64: 1>, scalar_prefetch = 0 : i64, scratch_operands = 0 : i64, tpu.core_type = #tpu.core_type<tc>, window_params = [{transform_indices = @transform_0, window_bounds = array<i64: 8, 1024>}, {pipeline_mode = #tpu.pipeline_mode<synchronous>, transform_indices = @transform_1, window_bounds = array<i64: 1024, 128>}, {pipeline_mode = #tpu.pipeline_mode<synchronous>, transform_indices = @transform_2, window_bounds = array<i64: 1, 128>}, {transform_indices = @transform_3, window_bounds = array<i64: 8, 1>}]} {
    %c0 = arith.constant 0 : index
    %c0_0 = arith.constant 0 : index
    %0 = vector.load %arg1[%c0, %c0_0] : memref<8x1024xf32, #tpu.memory_space<vmem>>, vector<8x1024xf32>
    %c0_1 = arith.constant 0 : index
    %c0_2 = arith.constant 0 : index
    %1 = vector.load %arg2[%c0_1, %c0_2] : memref<1024x128xf32, #tpu.memory_space<vmem>>, vector<1024x128xf32>
    %cst = arith.constant dense<0.000000e+00> : vector<8x128xf32>
    %2 = tpu.matmul %0, %1, %cst {dimension_numbers = #tpu.dot_dimension_numbers<[1], [0], [0], [1], [0, 0, 1, 1], [], []>} : vector<8x1024xf32>, vector<1024x128xf32>, vector<8x128xf32> -> vector<8x128xf32>
    %c0_3 = arith.constant 0 : index
    %c0_4 = arith.constant 0 : index
    %3 = vector.load %arg3[%c0_3, %c0_4] : memref<1x128xf32, #tpu.memory_space<vmem>>, vector<1x128xf32>
    %4 = vector.broadcast %3 : vector<1x128xf32> to vector<8x128xf32>
    %5 = arith.addf %2, %4 : vector<8x128xf32>
    %cst_5 = arith.constant dense<0xFF800000> : vector<8xf32>
    %6 = vector.multi_reduction <maximumf>, %5, %cst_5 [1] : vector<8x128xf32> to vector<8xf32>
    %7 = vector.shape_cast %6 : vector<8xf32> to vector<8x1xf32>
    %8 = vector.broadcast %7 : vector<8x1xf32> to vector<8x128xf32>
    %9 = arith.subf %5, %8 : vector<8x128xf32>
    %10 = math.exp %9 : vector<8x128xf32>
    %cst_6 = arith.constant dense<0.000000e+00> : vector<8xf32>
    %11 = vector.multi_reduction <add>, %10, %cst_6 [1] : vector<8x128xf32> to vector<8xf32>
    %12 = vector.shape_cast %11 : vector<8xf32> to vector<8x1xf32>
    %13 = tpu.reciprocal %12 {approx = true} : vector<8x1xf32> -> vector<8x1xf32>
    %14 = arith.mulf %12, %13 : vector<8x1xf32>
    %cst_7 = arith.constant 2.000000e+00 : f32
    %15 = vector.broadcast %cst_7 : f32 to vector<8x1xf32>
    %16 = arith.subf %15, %14 : vector<8x1xf32>
    %17 = arith.mulf %13, %16 : vector<8x1xf32>
    %18 = arith.mulf %12, %17 : vector<8x1xf32>
    %cst_8 = arith.constant 1.000000e-01 : f32
    %19 = vector.broadcast %cst_8 : f32 to vector<8x1xf32>
    %20 = arith.mulf %18, %19 : vector<8x1xf32>
    %21 = arith.mulf %20, %20 : vector<8x1xf32>
    %22 = arith.mulf %10, %10 : vector<8x128xf32>
    %cst_9 = arith.constant dense<0.000000e+00> : vector<8xf32>
    %23 = vector.multi_reduction <add>, %22, %cst_9 [1] : vector<8x128xf32> to vector<8xf32>
    %24 = vector.shape_cast %23 : vector<8xf32> to vector<8x1xf32>
    %25 = arith.mulf %17, %17 : vector<8x1xf32>
    %26 = arith.mulf %24, %25 : vector<8x1xf32>
    %cst_10 = arith.constant 0.00999999977 : f32
    %27 = vector.broadcast %cst_10 : f32 to vector<8x1xf32>
    %28 = arith.mulf %26, %27 : vector<8x1xf32>
    %29 = arith.subf %21, %28 : vector<8x1xf32>
    %c0_11 = arith.constant 0 : index
    %c0_12 = arith.constant 0 : index
    %30 = vector.load %arg4[%c0_11, %c0_12] : memref<8x1xf32, #tpu.memory_space<vmem>>, vector<8x1xf32>
    tpu.vector_store %arg4[%c0_11, %c0_12], %29 {strides = array<i32>} : memref<8x1xf32, #tpu.memory_space<vmem>>, vector<8x1xf32>,
    return
  }
  func.func @transform_0(%arg0: i32) -> (i32, i32) {
    %c0_i32 = arith.constant 0 : i32
    %c0_i32_0 = arith.constant 0 : i32
    return %arg0, %c0_i32 : i32, i32
  }
  func.func @transform_1(%arg0: i32) -> (i32, i32) {
    %c0_i32 = arith.constant 0 : i32
    %c0_i32_0 = arith.constant 0 : i32
    %c0_i32_1 = arith.constant 0 : i32
    return %c0_i32, %c0_i32_0 : i32, i32
  }
  func.func @transform_2(%arg0: i32) -> (i32, i32) {
    %c0_i32 = arith.constant 0 : i32
    %c0_i32_0 = arith.constant 0 : i32
    %c0_i32_1 = arith.constant 0 : i32
    return %c0_i32, %c0_i32_0 : i32, i32
  }
  func.func @transform_3(%arg0: i32) -> (i32, i32) {
    %c0_i32 = arith.constant 0 : i32
    %c0_i32_0 = arith.constant 0 : i32
    return %arg0, %c0_i32 : i32, i32
  }
}

</mosaic_0001>

<bundles_post_ra>
// kernel: tpu_custom_call.1
= control target key start
LH: loop header
LB: loop body
LE: loop exit
PB: predicated region body
PF: predicated region fallthrough
CT: control target
= control target key end

     0   :  { %8 = vsyncpa [#allocation3], 0  ;;  %s878_s0 = inlined_call_operand.hbm [shape: f32[8,1024], index: 0, kind: input, shape index: {}]   ;;  %s879_s1 = inlined_call_operand.hbm [shape: f32[1024,128], index: 1, kind: input, shape index: {}]   ;;  %s880_s2 = inlined_call_operand.vmem [shape: f32[1,128], index: 2, kind: input, shape index: {}]   ;;  %s881_s3 = inlined_call_operand.vmem [shape: f32[8,1], index: 3, kind: output, shape index: {}]  }
   0x1   :  { %9 = vsyncpa [#allocation5], 0  ;;  %s817_s12 = smov [#allocation2]   ;;  %s818_s14 = smov [#allocation4]  }
   0x2   :  { %s16_s13 = sshll.u32 %s817_s12, 4  ;;  %s25_s15 = sshll.u32 %s818_s14, 4  ;;  %s17_s13 = int_to_ptr.vmem [resolvable:$true] %s16_s13  ;;  %s841_s15 = int_to_ptr.vmem [resolvable:$true] %s25_s15 }
   0x3   :  { %s769_s18 = scalar_lea.hbm %s878_s0, 1024 }
   0x4   :  { %p770_p0 = scmp.ne.s32.totalorder %s878_s0, %s769_s18  ;;  %p773_p1 = scmp.lt.u32.totalorder %s769_s18, %s878_s0 }
   0x6   :  { %p775_p2 = pnand %p773_p1, %p770_p0 }
   0x8   :  { %778 = shalt.err (!%p775_p2)
}
   0x9   :  { %s779_s23 = scalar_lea.vmem %s17_s13, 1024  ;;  %p784_p4 = scmp.lt.s32.totalorder %s17_s13, %s17_s13 }
   0xa   :  { %p780_p3 = scmp.ne.s32.totalorder %s17_s13, %s779_s23  ;;  %p785_p5 = scmp.lt.s32.totalorder %s779_s23, %s779_s23 }
   0xc   :  { %p786_p6 = por %p785_p5, %p784_p4 }
   0xe   :  { %p787_p7 = pnand %p786_p6, %p780_p3 }
  0x10   :  { %790 = shalt.err (!%p787_p7)
}
  0x11   :  { %19 = dma.hbm_to_vmem [thread:$0]  %s878_s0, 1024, %s17_s13, [#allocation3]  }
  0x12   :  { %s791_s28 = scalar_lea.hbm %s879_s1, 16384 }
  0x13   :  { %p792_p8 = scmp.ne.s32.totalorder %s879_s1, %s791_s28  ;;  %p795_p9 = scmp.lt.u32.totalorder %s791_s28, %s879_s1 }
  0x15   :  { %p797_p10 = pnand %p795_p9, %p792_p8 }
  0x17   :  { %800 = shalt.err (!%p797_p10)
}
  0x18   :  { %s801_s6 = scalar_lea.vmem %s841_s15, 16384  ;;  %p806_p12 = scmp.lt.s32.totalorder %s841_s15, %s841_s15 }
  0x19   :  { %p802_p11 = scmp.ne.s32.totalorder %s841_s15, %s801_s6  ;;  %p807_p13 = scmp.lt.s32.totalorder %s801_s6, %s801_s6 }
  0x1b   :  { %p808_p0 = por %p807_p13, %p806_p12 }
  0x1d   :  { %p809_p1 = pnand %p808_p0, %p802_p11 }
  0x1f   :  { %812 = shalt.err (!%p809_p1)
}
  0x20   :  { %s819_s0 = smov 128   ;;  %s820_s7 = smov 8  }
  0x21   :  { %31 = dma.hbm_to_vmem [thread:$0]  %s879_s1, 16384, %s841_s15, [#allocation5], %s819_s0, %s819_s0, %s820_s7  }
  0x22   :  { %813 = dma.done.wait [#allocation3], 1024  }
  0x23   :  { %814 = vsyncadd [#allocation3], 4294966272 }
  0x24   :  { %815 = dma.done.wait [#allocation5], 16384  }
  0x25   :  { %816 = vsyncadd [#allocation5], 4294950912  ;;  %v64_v0 = vld [vmem:[#allocation4 + $0x80] sm:$0xff]  ;;  %v65_v1 = vld [vmem:[#allocation4 + $0x88] sm:$0xff]  ;;  %vm484_vm0 = vcmask 7168  }
  0x26   :  { %v48_v2 = vld [vmem:[#allocation4] sm:$0xff]  ;;  %v633_v3 = vpack.c.bf16 %v65_v1, %v64_v0  ;;  %v49_v4 = vld [vmem:[#allocation4 + $0x8] sm:$0xff]  ;;  %v66_v11 = vld [vmem:[#allocation4 + $0x90] sm:$0xff] }
  0x27   :  { %v96_v5 = vld [vmem:[#allocation4 + $0x180] sm:$0xff]  ;;  %v97_v6 = vld [vmem:[#allocation4 + $0x188] sm:$0xff]  ;;  %v635_v7 = vpack.c.bf16 %v49_v4, %v48_v2  ;;  %v67_v13 = vld [vmem:[#allocation4 + $0x98] sm:$0xff] }
  0x28   :  { %v665_v8 = vpack.c.bf16 %v97_v6, %v96_v5  ;;  %v80_v9 = vld [vmem:[#allocation4 + $0x100] sm:$0xff]  ;;  %v81_v10 = vld [vmem:[#allocation4 + $0x108] sm:$0xff]  ;;  %634 = vmatprep.subr.bf16.mxu0 %v633_v3  ;;  %v50_v14 = vld [vmem:[#allocation4 + $0x10] sm:$0xff]  ;;  %v637_v16 = vpack.c.bf16 %v67_v13, %v66_v11 }
  0x29   :  { %v667_v12 = vpack.c.bf16 %v81_v10, %v80_v9  ;;  %v51_v15 = vld [vmem:[#allocation4 + $0x18] sm:$0xff]  ;;  %636 = vmatpush3.bf16.msra.mxu0 %v635_v7  ;;  %v98_v18 = vld [vmem:[#allocation4 + $0x190] sm:$0xff]  ;;  %v68_v23 = vld [vmem:[#allocation4 + $0xa0] sm:$0xff] }
  0x2a   :  { %666 = vmatprep.subr.bf16.mxu1 %v665_v8  ;;  %v639_v17 = vpack.c.bf16 %v51_v15, %v50_v14  ;;  %v99_v19 = vld [vmem:[#allocation4 + $0x198] sm:$0xff]  ;;  %v82_v20 = vld [vmem:[#allocation4 + $0x110] sm:$0xff]  ;;  %v69_v24 = vld [vmem:[#allocation4 + $0xa8] sm:$0xff]  ;;  %638 = vmatprep.subr.bf16.mxu0 %v637_v16 }
  0x2b   :  { %668 = vmatpush3.bf16.msra.mxu1 %v667_v12  ;;  %v669_v21 = vpack.c.bf16 %v99_v19, %v98_v18  ;;  %v83_v22 = vld [vmem:[#allocation4 + $0x118] sm:$0xff]  ;;  %v641_v26 = vpack.c.bf16 %v69_v24, %v68_v23  ;;  %v52_v27 = vld [vmem:[#allocation4 + $0x20] sm:$0xff]  ;;  %v53_v28 = vld [vmem:[#allocation4 + $0x28] sm:$0xff] }
  0x2c   :  { %v671_v25 = vpack.c.bf16 %v83_v22, %v82_v20  ;;  %v100_v29 = vld [vmem:[#allocation4 + $0x1a0] sm:$0xff]  ;;  %v101_v30 = vld [vmem:[#allocation4 + $0x1a8] sm:$0xff]  ;;  %v643_v33 = vpack.c.bf16 %v53_v28, %v52_v27  ;;  %v70_v35 = vld [vmem:[#allocation4 + $0xb0] sm:$0xff] }
  0x2d   :  { %670 = vmatprep.subr.bf16.mxu1 %v669_v21  ;;  %v84_v31 = vld [vmem:[#allocation4 + $0x120] sm:$0xff]  ;;  %v85_v32 = vld [vmem:[#allocation4 + $0x128] sm:$0xff]  ;;  %640 = vmatpush3.bf16.msra.mxu0 %v639_v17  ;;  %v673_v34 = vpack.c.bf16 %v101_v30, %v100_v29  ;;  %v71_v36 = vld [vmem:[#allocation4 + $0xb8] sm:$0xff] }
  0x2e   :  { %v54_v37 = vld [vmem:[#allocation4 + $0x30] sm:$0xff]  ;;  %642 = vmatprep.subr.bf16.mxu0 %v641_v26  ;;  %v675_v38 = vpack.c.bf16 %v85_v32, %v84_v31  ;;  %v645_v39 = vpack.c.bf16 %v71_v36, %v70_v35  ;;  %v55_v40 = vld [vmem:[#allocation4 + $0x38] sm:$0xff]  ;;  %v72_v46 = vld [vmem:[#allocation4 + $0xc0] sm:$0xff] }
  0x2f   :  { %672 = vmatpush3.bf16.msra.mxu1 %v671_v25  ;;  %v102_v41 = vld [vmem:[#allocation4 + $0x1b0] sm:$0xff]  ;;  %v103_v42 = vld [vmem:[#allocation4 + $0x1b8] sm:$0xff]  ;;  %v73_v47 = vld [vmem:[#allocation4 + $0xc8] sm:$0xff]  ;;  %v647_v48 = vpack.c.bf16 %v55_v40, %v54_v37 }
  0x30   :  { %674 = vmatprep.subr.bf16.mxu1 %v673_v34  ;;  %v677_v43 = vpack.c.bf16 %v103_v42, %v102_v41  ;;  %v86_v44 = vld [vmem:[#allocation4 + $0x130] sm:$0xff]  ;;  %v87_v45 = vld [vmem:[#allocation4 + $0x138] sm:$0xff]  ;;  %v104_v49 = vld [vmem:[#allocation4 + $0x1c0] sm:$0xff]  ;;  %v649_v52 = vpack.c.bf16 %v73_v47, %v72_v46 }
  0x31   :  { %644 = vmatpush3.bf16.msra.mxu0 %v643_v33  ;;  %v105_v50 = vld [vmem:[#allocation4 + $0x1c8] sm:$0xff]  ;;  %v679_v51 = vpack.c.bf16 %v87_v45, %v86_v44  ;;  %v56_v53 = vld [vmem:[#allocation4 + $0x40] sm:$0xff]  ;;  %v74_v58 = vld [vmem:[#allocation4 + $0xd0] sm:$0xff] }
  0x32   :  { %646 = vmatprep.subr.bf16.mxu0 %v645_v39  ;;  %v57_v54 = vld [vmem:[#allocation4 + $0x48] sm:$0xff]  ;;  %v88_v55 = vld [vmem:[#allocation4 + $0x140] sm:$0xff]  ;;  %v681_v56 = vpack.c.bf16 %v105_v50, %v104_v49  ;;  %v75_v59 = vld [vmem:[#allocation4 + $0xd8] sm:$0xff] }
  0x33   :  { %676 = vmatpush3.bf16.msra.mxu1 %v675_v38  ;;  %v89_v57 = vld [vmem:[#allocation4 + $0x148] sm:$0xff]  ;;  %v106_v60 = vld [vmem:[#allocation4 + $0x1d0] sm:$0xff]  ;;  %v107_v61 = vld [vmem:[#allocation4 + $0x1d8] sm:$0xff]  ;;  %v651_v62 = vpack.c.bf16 %v57_v54, %v56_v53  ;;  %v653_v0 = vpack.c.bf16 %v75_v59, %v74_v58 }
  0x34   :  { %678 = vmatprep.subr.bf16.mxu1 %v677_v43  ;;  %v683_v63 = vpack.c.bf16 %v89_v57, %v88_v55  ;;  %v58_v1 = vld [vmem:[#allocation4 + $0x50] sm:$0xff]  ;;  %v59_v2 = vld [vmem:[#allocation4 + $0x58] sm:$0xff]  ;;  %v685_v4 = vpack.c.bf16 %v107_v61, %v106_v60  ;;  %v76_v6 = vld [vmem:[#allocation4 + $0xe0] sm:$0xff] }
  0x35   :  { %648 = vmatpush3.bf16.msra.mxu0 %v647_v48  ;;  %v90_v3 = vld [vmem:[#allocation4 + $0x150] sm:$0xff]  ;;  %v91_v5 = vld [vmem:[#allocation4 + $0x158] sm:$0xff]  ;;  %v77_v7 = vld [vmem:[#allocation4 + $0xe8] sm:$0xff]  ;;  %v655_v10 = vpack.c.bf16 %v59_v2, %v58_v1 }
  0x36   :  { %650 = vmatprep.subr.bf16.mxu0 %v649_v52  ;;  %v108_v8 = vld [vmem:[#allocation4 + $0x1e0] sm:$0xff]  ;;  %v109_v9 = vld [vmem:[#allocation4 + $0x1e8] sm:$0xff]  ;;  %v687_v13 = vpack.c.bf16 %v91_v5, %v90_v3  ;;  %v657_v14 = vpack.c.bf16 %v77_v7, %v76_v6  ;;  %v78_v19 = vld [vmem:[#allocation4 + $0xf0] sm:$0xff] }
  0x37   :  { %680 = vmatpush3.bf16.msra.mxu1 %v679_v51  ;;  %v60_v11 = vld [vmem:[#allocation4 + $0x60] sm:$0xff]  ;;  %v61_v12 = vld [vmem:[#allocation4 + $0x68] sm:$0xff]  ;;  %v689_v18 = vpack.c.bf16 %v109_v9, %v108_v8  ;;  %v79_v20 = vld [vmem:[#allocation4 + $0xf8] sm:$0xff] }
  0x38   :  { %682 = vmatprep.subr.bf16.mxu1 %v681_v56  ;;  %v92_v15 = vld [vmem:[#allocation4 + $0x160] sm:$0xff]  ;;  %v93_v16 = vld [vmem:[#allocation4 + $0x168] sm:$0xff]  ;;  %v43_v21 = vld [vmem:[#allocation2 + $0x18] sm:$0xff]  ;;  %v659_v24 = vpack.c.bf16 %v61_v12, %v60_v11  ;;  %v661_v26 = vpack.c.bf16 %v79_v20, %v78_v19 }
  0x39   :  { %652 = vmatpush3.bf16.msra.mxu0 %v651_v62  ;;  %v41_v17 = vld [vmem:[#allocation2 + $0x8] sm:$0xff]  ;;  %v110_v22 = vld [vmem:[#allocation4 + $0x1f0] sm:$0xff]  ;;  %v111_v23 = vld [vmem:[#allocation4 + $0x1f8] sm:$0xff]  ;;  %317 = vmatprep.mubr.f32.mxu1 %v43_v21  ;;  %v691_v25 = vpack.c.bf16 %v93_v16, %v92_v15 }
  0x3a   :  { %654 = vmatprep.subr.bf16.mxu0 %v653_v0  ;;  %247 = vmatprep.mubr.f32.mxu0 %v41_v17  ;;  %v62_v27 = vld [vmem:[#allocation4 + $0x70] sm:$0xff]  ;;  %v63_v28 = vld [vmem:[#allocation4 + $0x78] sm:$0xff]  ;;  %v693_v30 = vpack.c.bf16 %v111_v23, %v110_v22  ;;  %v128_v32 = vld [vmem:[#allocation4 + $0x280] sm:$0xff] }
  0x3b   :  { %684 = vmatpush3.bf16.msra.mxu1 %v683_v63  ;;  %v94_v29 = vld [vmem:[#allocation4 + $0x170] sm:$0xff]  ;;  %v95_v31 = vld [vmem:[#allocation4 + $0x178] sm:$0xff]  ;;  %v129_v33 = vld [vmem:[#allocation4 + $0x288] sm:$0xff]  ;;  %v663_v36 = vpack.c.bf16 %v63_v28, %v62_v27 }
  0x3c   :  { %686 = vmatprep.subr.bf16.mxu1 %v685_v4  ;;  %v160_v34 = vld [vmem:[#allocation4 + $0x380] sm:$0xff]  ;;  %v161_v35 = vld [vmem:[#allocation4 + $0x388] sm:$0xff]  ;;  %v695_v37 = vpack.c.bf16 %v95_v31, %v94_v29  ;;  %v697_v38 = vpack.c.bf16 %v129_v33, %v128_v32  ;;  %v130_v44 = vld [vmem:[#allocation4 + $0x290] sm:$0xff] }
  0x3d   :  { %656 = vmatpush3.bf16.msra.mxu0 %v655_v10  ;;  %v112_v39 = vld [vmem:[#allocation4 + $0x200] sm:$0xff]  ;;  %v113_v40 = vld [vmem:[#allocation4 + $0x208] sm:$0xff]  ;;  %v729_v42 = vpack.c.bf16 %v161_v35, %v160_v34  ;;  %v131_v45 = vld [vmem:[#allocation4 + $0x298] sm:$0xff] }
  0x3e   :  { %658 = vmatprep.subr.bf16.mxu0 %v657_v14  ;;  %v144_v41 = vld [vmem:[#allocation4 + $0x300] sm:$0xff]  ;;  %v145_v43 = vld [vmem:[#allocation4 + $0x308] sm:$0xff]  ;;  %v162_v46 = vld [vmem:[#allocation4 + $0x390] sm:$0xff]  ;;  %v699_v49 = vpack.c.bf16 %v113_v40, %v112_v39  ;;  %v701_v52 = vpack.c.bf16 %v131_v45, %v130_v44 }
  0x3f   :  { %688 = vmatpush3.bf16.msra.mxu1 %v687_v13  ;;  %v163_v47 = vld [vmem:[#allocation4 + $0x398] sm:$0xff]  ;;  %v40_v48 = vld [vmem:[#allocation2] sm:$0xff]  ;;  %v42_v50 = vld [vmem:[#allocation2 + $0x10] sm:$0xff]  ;;  %v731_v51 = vpack.c.bf16 %v145_v43, %v144_v41 }
  0x40   :  { %690 = vmatprep.subr.bf16.mxu1 %v689_v18  ;;  %v114_v53 = vld [vmem:[#allocation4 + $0x210] sm:$0xff]  ;;  %v115_v54 = vld [vmem:[#allocation4 + $0x218] sm:$0xff]  ;;  %v733_v56 = vpack.c.bf16 %v163_v47, %v162_v46  ;;  %v132_v58 = vld [vmem:[#allocation4 + $0x2a0] sm:$0xff] }
  0x41   :  { %660 = vmatpush3.bf16.msra.mxu0 %v659_v24  ;;  %v146_v55 = vld [vmem:[#allocation4 + $0x310] sm:$0xff]  ;;  %v147_v57 = vld [vmem:[#allocation4 + $0x318] sm:$0xff]  ;;  %v133_v59 = vld [vmem:[#allocation4 + $0x2a8] sm:$0xff]  ;;  %v703_v62 = vpack.c.bf16 %v115_v54, %v114_v53 }
  0x42   :  { %662 = vmatprep.subr.bf16.mxu0 %v661_v26  ;;  %v164_v60 = vld [vmem:[#allocation4 + $0x3a0] sm:$0xff]  ;;  %v165_v61 = vld [vmem:[#allocation4 + $0x3a8] sm:$0xff]  ;;  %v735_v63 = vpack.c.bf16 %v147_v57, %v146_v55  ;;  %v705_v0 = vpack.c.bf16 %v133_v59, %v132_v58  ;;  %v134_v6 = vld [vmem:[#allocation4 + $0x2b0] sm:$0xff] }
  0x43   :  { %692 = vmatpush3.bf16.msra.mxu1 %v691_v25  ;;  %v116_v1 = vld [vmem:[#allocation4 + $0x220] sm:$0xff]  ;;  %v117_v2 = vld [vmem:[#allocation4 + $0x228] sm:$0xff]  ;;  %v737_v4 = vpack.c.bf16 %v165_v61, %v164_v60  ;;  %v135_v7 = vld [vmem:[#allocation4 + $0x2b8] sm:$0xff] }
  0x44   :  { %694 = vmatprep.subr.bf16.mxu1 %v693_v30  ;;  %v148_v3 = vld [vmem:[#allocation4 + $0x320] sm:$0xff]  ;;  %v149_v5 = vld [vmem:[#allocation4 + $0x328] sm:$0xff]  ;;  %v166_v8 = vld [vmem:[#allocation4 + $0x3b0] sm:$0xff]  ;;  %v707_v10 = vpack.c.bf16 %v117_v2, %v116_v1  ;;  %v709_v12 = vpack.c.bf16 %v135_v7, %v134_v6 }
  0x45   :  { %664 = vmatpush3.bf16.msra.mxu0 %v663_v36  ;;  %v167_v9 = vld [vmem:[#allocation4 + $0x3b8] sm:$0xff]  ;;  %v739_v11 = vpack.c.bf16 %v149_v5, %v148_v3  ;;  %v118_v13 = vld [vmem:[#allocation4 + $0x230] sm:$0xff]  ;;  %v136_v18 = vld [vmem:[#allocation4 + $0x2c0] sm:$0xff] }
  0x46   :  { %698 = vmatprep.subr.bf16.mxu0 %v697_v38  ;;  %v119_v14 = vld [vmem:[#allocation4 + $0x238] sm:$0xff]  ;;  %v150_v15 = vld [vmem:[#allocation4 + $0x330] sm:$0xff]  ;;  %v741_v16 = vpack.c.bf16 %v167_v9, %v166_v8  ;;  %v137_v19 = vld [vmem:[#allocation4 + $0x2c8] sm:$0xff] }
  0x47   :  { %696 = vmatpush3.bf16.msra.mxu1 %v695_v37  ;;  %v151_v17 = vld [vmem:[#allocation4 + $0x338] sm:$0xff]  ;;  %v168_v20 = vld [vmem:[#allocation4 + $0x3c0] sm:$0xff]  ;;  %v169_v21 = vld [vmem:[#allocation4 + $0x3c8] sm:$0xff]  ;;  %v711_v22 = vpack.c.bf16 %v119_v14, %v118_v13  ;;  %v713_v26 = vpack.c.bf16 %v137_v19, %v136_v18 }
  0x48   :  { %730 = vmatprep.subr.bf16.mxu1 %v729_v42  ;;  %248 = vmatmul.mubr.f32.vlgmr.msra.gmra.mrb[0].mxu0 %v40_v48  ;;  %v45_v23 = vld [vmem:[#allocation2 + $0x28] sm:$0xff]  ;;  %v47_v24 = vld [vmem:[#allocation2 + $0x38] sm:$0xff]  ;;  %v743_v25 = vpack.c.bf16 %v151_v17, %v150_v15  ;;  %v120_v27 = vld [vmem:[#allocation4 + $0x240] sm:$0xff]  ;;  %v745_v30 = vpack.c.bf16 %v169_v21, %v168_v20 }
  0x49   :  { %700 = vmatpush3.bf16.msra.mxu0 %v699_v49  ;;  %v121_v28 = vld [vmem:[#allocation4 + $0x248] sm:$0xff]  ;;  %v152_v29 = vld [vmem:[#allocation4 + $0x340] sm:$0xff]  ;;  %v138_v32 = vld [vmem:[#allocation4 + $0x2d0] sm:$0xff]  ;;  %387 = vmatprep.mubr.f32.mxu0 %v45_v23 }
  0x4a   :  { %318 = vmatmul.mubr.f32.vlgmr.msra.gmra.mrb[0].mxu1 %v42_v50  ;;  %702 = vmatprep.subr.bf16.mxu0 %v701_v52  ;;  %v153_v31 = vld [vmem:[#allocation4 + $0x348] sm:$0xff]  ;;  %v139_v33 = vld [vmem:[#allocation4 + $0x2d8] sm:$0xff]  ;;  %v170_v34 = vld [vmem:[#allocation4 + $0x3d0] sm:$0xff]  ;;  %v715_v36 = vpack.c.bf16 %v121_v28, %v120_v27 }
  0x4b   :  { %732 = vmatpush3.bf16.msra.mxu1 %v731_v51  ;;  %v171_v35 = vld [vmem:[#allocation4 + $0x3d8] sm:$0xff]  ;;  %457 = vmatprep.mubr.f32.mxu1 %v47_v24  ;;  %v747_v37 = vpack.c.bf16 %v153_v31, %v152_v29  ;;  %v717_v38 = vpack.c.bf16 %v139_v33, %v138_v32  ;;  %v122_v39 = vld [vmem:[#allocation4 + $0x250] sm:$0xff]  ;;  %v140_v44 = vld [vmem:[#allocation4 + $0x2e0] sm:$0xff] }
  0x4c   :  { %734 = vmatprep.subr.bf16.mxu1 %v733_v56  ;;  %v123_v40 = vld [vmem:[#allocation4 + $0x258] sm:$0xff]  ;;  %v154_v41 = vld [vmem:[#allocation4 + $0x350] sm:$0xff]  ;;  %v749_v42 = vpack.c.bf16 %v171_v35, %v170_v34  ;;  %v141_v45 = vld [vmem:[#allocation4 + $0x2e8] sm:$0xff] }
  0x4d   :  { %704 = vmatpush3.bf16.msra.mxu0 %v703_v62  ;;  %v155_v43 = vld [vmem:[#allocation4 + $0x358] sm:$0xff]  ;;  %v172_v46 = vld [vmem:[#allocation4 + $0x3e0] sm:$0xff]  ;;  %v173_v47 = vld [vmem:[#allocation4 + $0x3e8] sm:$0xff]  ;;  %v719_v48 = vpack.c.bf16 %v123_v40, %v122_v39  ;;  %v721_v50 = vpack.c.bf16 %v141_v45, %v140_v44 }
  0x4e   :  { %706 = vmatprep.subr.bf16.mxu0 %v705_v0  ;;  %v751_v49 = vpack.c.bf16 %v155_v43, %v154_v41  ;;  %v124_v51 = vld [vmem:[#allocation4 + $0x260] sm:$0xff]  ;;  %v125_v52 = vld [vmem:[#allocation4 + $0x268] sm:$0xff]  ;;  %v753_v54 = vpack.c.bf16 %v173_v47, %v172_v46  ;;  %v142_v56 = vld [vmem:[#allocation4 + $0x2f0] sm:$0xff] }
  0x4f   :  { %736 = vmatpush3.bf16.msra.mxu1 %v735_v63  ;;  %v156_v53 = vld [vmem:[#allocation4 + $0x360] sm:$0xff]  ;;  %v157_v55 = vld [vmem:[#allocation4 + $0x368] sm:$0xff]  ;;  %v143_v57 = vld [vmem:[#allocation4 + $0x2f8] sm:$0xff]  ;;  %v723_v60 = vpack.c.bf16 %v125_v52, %v124_v51 }
  0x50   :  { %738 = vmatprep.subr.bf16.mxu1 %v737_v4  ;;  %v174_v58 = vld [vmem:[#allocation4 + $0x3f0] sm:$0xff]  ;;  %v175_v59 = vld [vmem:[#allocation4 + $0x3f8] sm:$0xff]  ;;  %v755_v61 = vpack.c.bf16 %v157_v55, %v156_v53  ;;  %v725_v62 = vpack.c.bf16 %v143_v57, %v142_v56  ;;  %v44_v6 = vld [vmem:[#allocation2 + $0x20] sm:$0xff] }
  0x51   :  { %708 = vmatpush3.bf16.msra.mxu0 %v707_v10  ;;  %v126_v63 = vld [vmem:[#allocation4 + $0x270] sm:$0xff]  ;;  %v127_v0 = vld [vmem:[#allocation4 + $0x278] sm:$0xff]  ;;  %v757_v1 = vpack.c.bf16 %v175_v59, %v174_v58  ;;  %v492_v9 = vld [vmem:[%s880_s2] ss:$0 sm:$0xff] }
  0x52   :  { %710 = vmatprep.subr.bf16.mxu0 %v709_v12  ;;  %v158_v2 = vld [vmem:[#allocation4 + $0x370] sm:$0xff]  ;;  %v159_v3 = vld [vmem:[#allocation4 + $0x378] sm:$0xff]  ;;  %v727_v4 = vpack.c.bf16 %v127_v0, %v126_v63 }
  0x53   :  { %740 = vmatpush3.bf16.msra.mxu1 %v739_v11  ;;  %v759_v5 = vpack.c.bf16 %v159_v3, %v158_v2  ;;  %v46_v7 = vld [vmem:[#allocation2 + $0x30] sm:$0xff] }
  0x54   :  { %742 = vmatprep.subr.bf16.mxu1 %v741_v16 }
  0x55   :  { %712 = vmatpush3.bf16.msra.mxu0 %v711_v22 }
  0x56   :  { %714 = vmatprep.subr.bf16.mxu0 %v713_v26 }
  0x57   :  { %744 = vmatpush3.bf16.msra.mxu1 %v743_v25 }
  0x58   :  { %746 = vmatprep.subr.bf16.mxu1 %v745_v30 }
  0x59   :  { %716 = vmatpush3.bf16.msra.mxu0 %v715_v36 }
  0x5a   :  { %718 = vmatprep.subr.bf16.mxu0 %v717_v38 }
  0x5b   :  { %748 = vmatpush3.bf16.msra.mxu1 %v747_v37 }
  0x5c   :  { %750 = vmatprep.subr.bf16.mxu1 %v749_v42 }
  0x5d   :  { %720 = vmatpush3.bf16.msra.mxu0 %v719_v48 }
  0x5e   :  { %722 = vmatprep.subr.bf16.mxu0 %v721_v50 }
  0x5f   :  { %752 = vmatpush3.bf16.msra.mxu1 %v751_v49 }
  0x60   :  { %754 = vmatprep.subr.bf16.mxu1 %v753_v54 }
  0x61   :  { %724 = vmatpush3.bf16.msra.mxu0 %v723_v60 }
  0x62   :  { %726 = vmatprep.subr.bf16.mxu0 %v725_v62 }
  0x63   :  { %756 = vmatpush3.bf16.msra.mxu1 %v755_v61 }
  0x64   :  { %758 = vmatprep.subr.bf16.mxu1 %v757_v1 }
  0x65   :  { %728 = vmatpush3.bf16.msra.mxu0 %v727_v4 }
  0x67   :  { %760 = vmatpush3.bf16.msra.mxu1 %v759_v5 }
  0x68   :  { %388 = vmatmul.mubr.f32.vlgmr.msra.gmra.mrb[2].mxu0 %v44_v6 }
  0x6a   :  { %458 = vmatmul.mubr.f32.vlgmr.msra.gmra.mrb[2].mxu1 %v46_v7 }
 0x11b   :  { %v525_v8 = vpop.f32.mrb[0].mxu0 }
 0x11c   :  { %v526_v10 = vpop.f32.mrb[1].mxu0 }
 0x11d   :  { %v560_v11 = vpop.f32.mrb[0].mxu1  ;;  %v527_v12 = vadd.f32 %v526_v10, %v525_v8 }
 0x11e   :  { %v561_v13 = vpop.f32.mrb[1].mxu1 }
 0x11f   :  { %v562_v14 = vadd.f32 %v561_v13, %v560_v11  ;;  %v250_v15 = vadd.f32 %v527_v12, %v492_v9 }
 0x121   :  { %v320_v16 = vadd.f32 %v562_v14, %v250_v15 }
 0x13b   :  { %v595_v17 = vpop.f32.mrb[2].mxu0 }
 0x13c   :  { %v596_v18 = vpop.f32.mrb[3].mxu0 }
 0x13d   :  { %v630_v19 = vpop.f32.mrb[2].mxu1  ;;  %v597_v20 = vadd.f32 %v596_v18, %v595_v17 }
 0x13e   :  { %v631_v21 = vpop.f32.mrb[3].mxu1 }
 0x13f   :  { %v632_v22 = vadd.f32 %v631_v21, %v630_v19  ;;  %v390_v23 = vadd.f32 %v597_v20, %v320_v16 }
 0x141   :  { %v460_v24 = vadd.f32 %v632_v22, %v390_v23 }
 0x143   :  { %463 = vmax.xlane.f32.xlu0 %v460_v24 }
 0x1d0   :  { %v464_v25 = vpop.xlane.xlu0 %463 }
 0x1d1   :  { %v465_v26 = vsub.f32 %v460_v24, %v464_v25 }
 0x1d3   :  { %v466_v27 = vmul.f32 1.442695, %v465_v26 }
 0x1d5   :  { %765 = vpow2.f32 %v466_v27 }
 0x1df   :  { %v766_v28 = vpop.eup %765 }
 0x1e0   :  { %468 = vadd.xlane.f32.xlu0 %v766_v28  ;;  %v477_v29 = vmul.f32 %v766_v28, %v766_v28 }
 0x1e2   :  { %478 = vadd.xlane.f32.xlu1 %v477_v29 }
 0x26d   :  { %v469_v30 = vpop.xlane.xlu0 %468 }
 0x26e   :  { %767 = vrcp.f32 %v469_v30 }
 0x26f   :  { %v479_v37 = vpop.xlane.xlu1 %478 }
 0x278   :  { %v768_v31 = vpop.eup %767 }
 0x279   :  { %v471_v32 = vmul.f32 %v768_v31, %v469_v30 }
 0x27b   :  { %v472_v33 = vsub.f32 2.0, %v471_v32 }
 0x27d   :  { %v473_v34 = vmul.f32 %v768_v31, %v472_v33 }
 0x27f   :  { %v474_v35 = vmul.f32 %v473_v34, %v469_v30  ;;  %v480_v36 = vmul.f32 %v473_v34, %v473_v34 }
 0x281   :  { %v475_v38 = vmul.f32 0.1, %v474_v35  ;;  %v481_v39 = vmul.f32 %v480_v36, %v479_v37 }
 0x283   :  { %v476_v40 = vmul.f32 %v475_v38, %v475_v38  ;;  %v482_v41 = vmul.f32 0.01, %v481_v39 }
 0x285   :  { %v483_v42 = vsub.f32 %v476_v40, %v482_v41 }
 0x287   :  { %485 = vst.msk [vmem:[%s881_s3] sm:$0xff] %vm484_vm0, %v483_v42 }
 0x288   :  { %490 = vsyncpa [#allocation3], 1 }
 0x289   :  { %491 = vsyncpa [#allocation5], 1 }

</bundles_post_ra>
